<compile_context>
chip_gen: v7x
topology: tpu7x:2x2x1
jax: 0.10.0
libtpu: 0.0.40
codegen_flags: <defaults>
</compile_context>

<pallas_src>
import jax
import jax.numpy as jnp
from jax.experimental import pallas as pl
from jax.experimental.pallas import tpu as pltpu
from typing import NamedTuple


def _round_up(x, m):
    return (x + m - 1) // m * m


def _vmem_budget():
    """(capacity, vmem_limit_bytes for the compiler, tile-selection budget)."""
    cap = 64 * 1024 * 1024  # conservative default = v7x per-TensorCore VMEM
    try:
        info = pltpu.get_tpu_info()
        cap_attr = getattr(info, "vmem_capacity_bytes", None)
        if cap_attr:
            cap = int(cap_attr)
    except Exception:
        pass
    vmem_limit = int(cap * 0.85)   # leave headroom for compiler-internal scratch
    budget = int(vmem_limit * 0.90)
    return cap, vmem_limit, budget


class NGLUPrepared(NamedTuple):
    w12: jnp.ndarray   # (D, 2*mid_p) interleaved per tile_mid block, gains folded
    w3: jnp.ndarray    # (mid_p, D)   zero-padded rows for padded mid channels
    tile_mid: int
    mid_p: int


def nglu_prepare(w1_t, w2_t, w3_t, sv, su, embed_dim, *, tile_mid=512):
    """One-time weight preparation (do NOT call per forward).

    w1_t/w2_t: (D, mid) = W1^T/W2^T, w3_t: (mid, D) = W3^T, sv/su: (mid,).
    """
    D, mid = w1_t.shape
    assert w2_t.shape == (D, mid) and w3_t.shape == (mid, D)

    scale = float(embed_dim) ** 0.5  # suv_init_value / suv_init_scaling == 1.0
    sv_s = (sv.astype(jnp.float32) * scale).reshape(1, mid)
    su_s = (su.astype(jnp.float32) * scale).reshape(1, mid)
    # Fold gains into the up-projection columns (f32 math, cast back to the
    # weight dtype; exact for f32 weights, tiny quantization for bf16).
    w1s = (w1_t.astype(jnp.float32) * sv_s).astype(w1_t.dtype)
    w2s = (w2_t.astype(jnp.float32) * su_s).astype(w2_t.dtype)

    mid128 = _round_up(mid, 128)
    wb = w1_t.dtype.itemsize
    _, _, budget = _vmem_budget()

    # Fast path: whole (double-buffered) weight set comfortably fits VMEM.
    if 2 * 3 * D * mid128 * wb <= budget // 2:
        t_mid = mid128
    else:
        t_mid = min(_round_up(tile_mid, 128), mid128)
    mid_p = _round_up(mid, t_mid)  # multiple of 128 (t_mid is)

    if mid_p != mid:
        pad = mid_p - mid
        w1s = jnp.pad(w1s, ((0, 0), (0, pad)))
        w2s = jnp.pad(w2s, ((0, 0), (0, pad)))
        w3p = jnp.pad(w3_t, ((0, pad), (0, 0)))
    else:
        w3p = w3_t

    nt = mid_p // t_mid
    # Blocked interleave so block j holds [W1 tile j | W2 tile j] contiguously.
    w12 = jnp.concatenate(
        [w1s.reshape(D, nt, 1, t_mid), w2s.reshape(D, nt, 1, t_mid)], axis=2
    ).reshape(D, 2 * mid_p)
    return NGLUPrepared(w12=w12, w3=w3p, tile_mid=t_mid, mid_p=mid_p)


# TODO(synk): only the silu activation of get_activation_fn is implemented here.
def _compute_block(x_ref, w12_ref, w3_ref):
    t_mid = w3_ref.shape[0]
    x = x_ref[...]
    # Fused up-projection (W1|W2 interleaved), f32 MXU accumulation.
    vu = jnp.dot(x, w12_ref[...], preferred_element_type=jnp.float32)
    v = vu[:, :t_mid]          # lane-aligned split (t_mid is a multiple of 128)
    u = vu[:, t_mid:]
    h = u * v * jax.nn.sigmoid(v)      # u * silu(v); sigmoid goes to the EUP
    # Cast to the weight dtype so bf16 models run the down-proj at bf16 rate.
    return jnp.dot(h.astype(w3_ref.dtype), w3_ref[...],
                   preferred_element_type=jnp.float32)


def _kernel_single(x_ref, w12_ref, w3_ref, o_ref):
    # Weights fully VMEM resident; no reduction axis.
    o_ref[...] = _compute_block(x_ref, w12_ref, w3_ref).astype(o_ref.dtype)


def _kernel_acc_out(x_ref, w12_ref, w3_ref, o_ref):
    # Streaming mid; f32 output block is resident across j -> accumulate in it.
    @pl.when(pl.program_id(1) == 0)
    def _():
        o_ref[...] = jnp.zeros_like(o_ref)
    o_ref[...] += _compute_block(x_ref, w12_ref, w3_ref)


def _kernel_acc_scratch(x_ref, w12_ref, w3_ref, o_ref, acc_ref):
    # Streaming mid with an f32 accumulator scratch (non-f32 outputs).
    j = pl.program_id(1)

    @pl.when(j == 0)
    def _():
        acc_ref[...] = jnp.zeros_like(acc_ref)

    acc_ref[...] += _compute_block(x_ref, w12_ref, w3_ref)

    @pl.when(j == pl.num_programs(1) - 1)
    def _():
        o_ref[...] = acc_ref[...].astype(o_ref.dtype)


def nglu_forward(x, prep: NGLUPrepared, *, tile_m=None):
    """x: (B, L, D); prep from nglu_prepare. Returns (B, L, D)."""
    B, L, D = x.shape
    M = B * L
    w12, w3p = prep.w12, prep.w3
    t_mid, mid_p = prep.tile_mid, prep.mid_p
    nt = mid_p // t_mid
    single = nt == 1

    out_dtype = x.dtype
    acc_in_out = (not single) and (out_dtype == jnp.float32)
    use_scratch = (not single) and (not acc_in_out)

    sub = 16 if x.dtype == jnp.bfloat16 else 8
    xb = x.dtype.itemsize
    ob = jnp.dtype(out_dtype).itemsize
    wb = w12.dtype.itemsize

    _, vmem_limit, budget = _vmem_budget()

    def est_vmem(tm):
        io = 2 * tm * D * (xb + ob)                 # x + out tiles, double-buffered
        wts = 2 * 3 * D * t_mid * wb                # w12 + w3 slices, double-buffered
        acc = tm * D * 4 if use_scratch else 0      # f32 accumulator scratch
        tmp = 3 * tm * t_mid * 4                    # vu/h intermediates headroom
        return io + wts + acc + tmp

    m_full = _round_up(M, sub)
    if tile_m is None:
        cands = sorted(
            {min(_round_up(c, sub), m_full)
             for c in (1024, 768, 512, 384, 256, 192, 128, 64, 32, 16, 8)},
            reverse=True)
        tile_m = cands[-1]
        for tm in cands:
            if est_vmem(tm) <= budget:
                tile_m = tm
                break
    else:
        tile_m = min(_round_up(max(tile_m, sub), sub), m_full)
    # Keep >=2 row tiles whenever possible so the "parallel" axis can feed
    # both TensorCores (v7x megacore) and overlap DMA with compute.
    if M >= 2 * sub:
        tile_m = min(tile_m, _round_up((M + 1) // 2, sub))

    Mp = _round_up(M, tile_m)
    x2 = x.reshape(M, D)
    if Mp != M:
        x2 = jnp.pad(x2, ((0, Mp - M), (0, 0)))

    if single:
        grid = (Mp // tile_m,)
        in_specs = [
            pl.BlockSpec((tile_m, D), lambda i: (i, 0)),       # x rows
            pl.BlockSpec((D, 2 * mid_p), lambda i: (0, 0)),    # fused W1|W2 (resident)
            pl.BlockSpec((mid_p, D), lambda i: (0, 0)),        # W3^T (resident)
        ]
        out_spec = pl.BlockSpec((tile_m, D), lambda i: (i, 0))
        kernel = _kernel_single
        scratch = ()
        dims = ("parallel",)
    else:
        grid = (Mp // tile_m, nt)
        in_specs = [
            pl.BlockSpec((tile_m, D), lambda i, j: (i, 0)),    # x rows (resident over j)
            pl.BlockSpec((D, 2 * t_mid), lambda i, j: (0, j)), # fused W1|W2 slice
            pl.BlockSpec((t_mid, D), lambda i, j: (j, 0)),     # W3^T slice
        ]
        out_spec = pl.BlockSpec((tile_m, D), lambda i, j: (i, 0))
        if acc_in_out:
            kernel = _kernel_acc_out
            scratch = ()
        else:
            kernel = _kernel_acc_scratch
            scratch = (pltpu.VMEM((tile_m, D), jnp.float32),)
        dims = ("parallel", "arbitrary")

    out2 = pl.pallas_call(
        kernel,
        out_shape=jax.ShapeDtypeStruct((Mp, D), out_dtype),
        grid_spec=pltpu.PrefetchScalarGridSpec(
            num_scalar_prefetch=0,
            grid=grid,
            in_specs=in_specs,
            out_specs=out_spec,
            scratch_shapes=scratch,
        ),
        compiler_params=pltpu.CompilerParams(
            dimension_semantics=dims,
            vmem_limit_bytes=vmem_limit,
        ),
    )(x2, w12, w3p)

    return out2[:M].reshape(B, L, D)


def _reference(x, w1_t, w2_t, w3_t, sv, su, embed_dim):
    scale = embed_dim ** 0.5
    hp = jax.lax.Precision.HIGHEST
    v = jnp.dot(x, w1_t, precision=hp)
    u = jnp.dot(x, w2_t, precision=hp)
    v = sv * scale * v
    u = su * scale * u
    return jnp.dot(u * jax.nn.silu(v), w3_t, precision=hp)


if __name__ == "__main__":
    # Small shapes consistent with the module: (batch, seq, embed_dim),
    # mid_dim = 2 * embed_dim, bias=False, activation = silu.
    B, L, D, MID = 2, 16, 128, 256

    key = jax.random.PRNGKey(0)
    k_x, k_w1, k_w2, k_w3, k_sv, k_su = jax.random.split(key, 6)

    x = jax.random.normal(k_x, (B, L, D), dtype=jnp.float32)
    # PyTorch Linear stores (out, in); the kernel takes the transposed (in, out)
    # layout, materialized once at weight-prep time.
    w1_t = jax.random.normal(k_w1, (D, MID), dtype=jnp.float32) / jnp.sqrt(D)
    w2_t = jax.random.normal(k_w2, (D, MID), dtype=jnp.float32) / jnp.sqrt(D)
    w3_t = jax.random.normal(k_w3, (MID, D), dtype=jnp.float32) / jnp.sqrt(MID)
    # Non-trivial gains so the fold-into-weights path is actually exercised.
    sv = 1.0 + 0.1 * jax.random.normal(k_sv, (MID,), dtype=jnp.float32)
    su = 1.0 + 0.1 * jax.random.normal(k_su, (MID,), dtype=jnp.float32)

    prep = nglu_prepare(w1_t, w2_t, w3_t, sv, su, embed_dim=D)
    out = nglu_forward(x, prep)
    out = jax.block_until_ready(out)

    ref = _reference(x, w1_t, w2_t, w3_t, sv, su, D)
    assert out.shape == (B, L, D)
    rel_err = jnp.max(jnp.abs(out - ref)) / (jnp.max(jnp.abs(ref)) + 1e-6)
    assert rel_err < 2e-2, f"mismatch vs reference: rel_err={rel_err}"

    print("KERNEL_OK")
</pallas_src>

<mosaic_0001>
module attributes {stable_mosaic.version = 11 : i64} {
  func.func @_kernel_single(%arg0: i32, %arg1: memref<16x128xf32, #tpu.memory_space<vmem>>, %arg2: memref<128x512xf32, #tpu.memory_space<vmem>>, %arg3: memref<256x128xf32, #tpu.memory_space<vmem>>, %arg4: memref<16x128xf32, #tpu.memory_space<vmem>>) attributes {dimension_semantics = [#tpu.dimension_semantics<parallel>], iteration_bounds = array<i64: 2>, scalar_prefetch = 0 : i64, scratch_operands = 0 : i64, tpu.core_type = #tpu.core_type<tc>, window_params = [{transform_indices = @transform_0, window_bounds = array<i64: 16, 128>}, {pipeline_mode = #tpu.pipeline_mode<synchronous>, transform_indices = @transform_1, window_bounds = array<i64: 128, 512>}, {pipeline_mode = #tpu.pipeline_mode<synchronous>, transform_indices = @transform_2, window_bounds = array<i64: 256, 128>}, {transform_indices = @transform_3, window_bounds = array<i64: 16, 128>}]} {
    %c0 = arith.constant 0 : index
    %c0_0 = arith.constant 0 : index
    %0 = vector.load %arg1[%c0, %c0_0] : memref<16x128xf32, #tpu.memory_space<vmem>>, vector<16x128xf32>
    %c0_1 = arith.constant 0 : index
    %c0_2 = arith.constant 0 : index
    %1 = vector.load %arg2[%c0_1, %c0_2] : memref<128x512xf32, #tpu.memory_space<vmem>>, vector<128x512xf32>
    %cst = arith.constant dense<0.000000e+00> : vector<16x512xf32>
    %2 = tpu.matmul %0, %1, %cst {dimension_numbers = #tpu.dot_dimension_numbers<[1], [0], [0], [1], [0, 0, 1, 1], [], []>} : vector<16x128xf32>, vector<128x512xf32>, vector<16x512xf32> -> vector<16x512xf32>
    %3 = vector.extract_strided_slice %2 {offsets = [0, 0], sizes = [16, 256], strides = [1, 1]} : vector<16x512xf32> to vector<16x256xf32>
    %4 = vector.extract_strided_slice %2 {offsets = [0, 256], sizes = [16, 256], strides = [1, 1]} : vector<16x512xf32> to vector<16x256xf32>
    %5 = arith.mulf %4, %3 : vector<16x256xf32>
    %6 = arith.negf %3 : vector<16x256xf32>
    %7 = math.exp %6 : vector<16x256xf32>
    %cst_3 = arith.constant 1.000000e+00 : f32
    %8 = vector.broadcast %cst_3 : f32 to vector<16x256xf32>
    %9 = arith.addf %8, %7 : vector<16x256xf32>
    %10 = arith.divf %8, %9 : vector<16x256xf32>
    %11 = arith.mulf %5, %10 : vector<16x256xf32>
    %c0_4 = arith.constant 0 : index
    %c0_5 = arith.constant 0 : index
    %12 = vector.load %arg3[%c0_4, %c0_5] : memref<256x128xf32, #tpu.memory_space<vmem>>, vector<256x128xf32>
    %cst_6 = arith.constant dense<0.000000e+00> : vector<16x128xf32>
    %13 = tpu.matmul %11, %12, %cst_6 {dimension_numbers = #tpu.dot_dimension_numbers<[1], [0], [0], [1], [0, 0, 1, 1], [], []>} : vector<16x256xf32>, vector<256x128xf32>, vector<16x128xf32> -> vector<16x128xf32>
    %c0_7 = arith.constant 0 : index
    %c0_8 = arith.constant 0 : index
    %14 = vector.load %arg4[%c0_7, %c0_8] : memref<16x128xf32, #tpu.memory_space<vmem>>, vector<16x128xf32>
    tpu.vector_store %arg4[%c0_7, %c0_8], %13 {strides = array<i32>} : memref<16x128xf32, #tpu.memory_space<vmem>>, vector<16x128xf32>,
    return
  }
  func.func @transform_0(%arg0: i32) -> (i32, i32) {
    %c0_i32 = arith.constant 0 : i32
    %c0_i32_0 = arith.constant 0 : i32
    return %arg0, %c0_i32 : i32, i32
  }
  func.func @transform_1(%arg0: i32) -> (i32, i32) {
    %c0_i32 = arith.constant 0 : i32
    %c0_i32_0 = arith.constant 0 : i32
    %c0_i32_1 = arith.constant 0 : i32
    return %c0_i32, %c0_i32_0 : i32, i32
  }
  func.func @transform_2(%arg0: i32) -> (i32, i32) {
    %c0_i32 = arith.constant 0 : i32
    %c0_i32_0 = arith.constant 0 : i32
    %c0_i32_1 = arith.constant 0 : i32
    return %c0_i32, %c0_i32_0 : i32, i32
  }
  func.func @transform_3(%arg0: i32) -> (i32, i32) {
    %c0_i32 = arith.constant 0 : i32
    %c0_i32_0 = arith.constant 0 : i32
    return %arg0, %c0_i32 : i32, i32
  }
}

</mosaic_0001>

<bundles_post_ra>
// kernel: tpu_custom_call.1
= control target key start
LH: loop header
LB: loop body
LE: loop exit
PB: predicated region body
PF: predicated region fallthrough
CT: control target
= control target key end

     0   :  { %8 = vsyncpa [#allocation3], 0  ;;  %s1392_s0 = inlined_call_operand.hbm [shape: f32[32,128], index: 0, kind: input, shape index: {}]   ;;  %s1393_s1 = inlined_call_operand.hbm [shape: f32[128,512], index: 1, kind: input, shape index: {}]   ;;  %s1394_s2 = inlined_call_operand.hbm [shape: f32[256,128], index: 2, kind: input, shape index: {}]   ;;  %s1395_s3 = inlined_call_operand.hbm [shape: f32[32,128], index: 3, kind: output, shape index: {}]  }
   0x1   :  { %10 = vsyncpa [#allocation3 + $0x1], 0 }
   0x2   :  { %11 = vsyncpa [#allocation6], 0 }
   0x3   :  { %12 = vsyncpa [#allocation4], 0 }
   0x4   :  { %14 = vsyncpa [#allocation4 + $0x1], 0  ;;  %s1140_s12 = smov 0   ;;  %s1142_s13 = smov 0  }
   0x5   :  { %s1144_s14 = smov 0   ;;  %s1146_s15 = smov 0  }
   0x6 LB: > { %s1161_s16 = sadd.s32 4294967295, %s1107_s15   ;;  %s687_s17 = sadd.s32 4294967294, %s1107_s15   ;;  %s1107_s15 = sphi %s1146_s15, %s1415_s15   ;;  %s1103_s14 = sphi %s1144_s14, %s1414_s14   ;;  %s1099_s13 = sphi %s1142_s13, %s1413_s13   ;;  %s1095_s12 = sphi %s1140_s12, %s1412_s12  }
   0x7   : > { %p40_p0 = scmp.ne.s32.totalorder %s1099_s13, %s1095_s12  ;;  %p1396_p1 = scmp.eq.s32.totalorder %s1161_s16, 0 }
   0x8   : > { %p112_p3 = scmp.eq.s32.totalorder %s687_s17, 1  ;;  %p688_p5 = scmp.ge.s32.totalorder %s1107_s15, 1 }
   0x9   : > { %p1170_p4 = por %p1396_p1, %p40_p0  ;;  %p119_p7 = scmp.lt.s32.totalorder %s1107_s15, 3 }
   0xa   : > { %p1175_p6 = por %p112_p3, %p40_p0  ;;  %s1109_s21 = smov [#allocation5]  }
   0xb   : > { %s1399_s18 = scalar_select %p1170_p4, 1, 0 }
   0xc   : > { %s1400_s19 = scalar_select %p1175_p6, 1, 0 }
   0xd   : > { %p1180_p8 = pnand %p688_p5, %p119_p7  ;;  %s131_s22 = sshll.u32 %s1109_s21, 4  ;;  %s1184_s22 = int_to_ptr.vmem [resolvable:$true] %s131_s22 }
   0xe   : > { %s1110_s24 = smov [#allocation7]   ;;  %s951_s28 = scalar_lea.hbm %s1393_s1, 8192 }
   0xf   : > { %p873_p9 = pneg %p1180_p8  ;;  %s144_s25 = sshll.u32 %s1110_s24, 4  ;;  %s1195_s25 = int_to_ptr.vmem [resolvable:$true] %s144_s25 }
  0x10   : > { %p952_p12 = scmp.ne.s32.totalorder %s1393_s1, %s951_s28  ;;  %p958_p5 = scmp.lt.u32.totalorder %s951_s28, %s1393_s1 }
  0x11   : > { %p1191_p11 = pnand %p873_p9, %p1396_p1 }
  0x13   : > { %p953_p13 = pneg %p1191_p11 }
  0x15   : > { %p954_p0 = pnand %p953_p13, %p952_p12 }
  0x17   : > { %p955_p3 = pneg %p954_p0 }
  0x19   : > { %p960_p7 = pnand %p958_p5, %p955_p3 }
  0x1b   : > { %963 = shalt.err (!%p960_p7)
}
  0x1c   : > { %s964_s6 = scalar_lea.vmem %s1184_s22, 8192  ;;  %p972_p2 = scmp.lt.s32.totalorder %s1184_s22, %s1184_s22 }
  0x1d   : > { %p965_p9 = scmp.ne.s32.totalorder %s1184_s22, %s964_s6  ;;  %p973_p12 = scmp.lt.s32.totalorder %s964_s6, %s964_s6 }
  0x1f   : > { %p967_p10 = pnand %p965_p9, %p953_p13  ;;  %p974_p0 = por %p973_p12, %p972_p2 }
  0x21   : > { %p968_p1 = pneg %p967_p10 }
  0x23   : > { %p975_p6 = pnand %p974_p0, %p968_p1 }
  0x25   : > { %978 = shalt.err (!%p975_p6)
}
  0x26   : > { %s1111_s7 = smov 512   ;;  %s1112_s8 = smov 32  }
  0x27   : > { %876 = dma.hbm_to_vmem [thread:$0]  (!%p1191_p11), %s1393_s1, 8192, %s1184_s22, [#allocation6], %s1111_s7, %s1111_s7, %s1112_s8  }
  0x28   : > { %s979_s21 = scalar_lea.hbm %s1394_s2, 4096 }
  0x29   : > { %p980_p2 = scmp.ne.s32.totalorder %s1394_s2, %s979_s21  ;;  %p986_p10 = scmp.lt.u32.totalorder %s979_s21, %s1394_s2 }
  0x2b   : > { %p982_p1 = pnand %p980_p2, %p953_p13 }
  0x2d   : > { %p983_p6 = pneg %p982_p1 }
  0x2f   : > { %p988_p3 = pnand %p986_p10, %p983_p6 }
  0x31   : > { %991 = shalt.err (!%p988_p3)
}
  0x32   : > { %s992_s22 = scalar_lea.vmem %s1195_s25, 4096  ;;  %p1000_p12 = scmp.lt.s32.totalorder %s1195_s25, %s1195_s25 }
  0x33   : > { %p993_p5 = scmp.ne.s32.totalorder %s1195_s25, %s992_s22  ;;  %p1001_p0 = scmp.lt.s32.totalorder %s992_s22, %s992_s22 }
  0x35   : > { %p995_p7 = pnand %p993_p5, %p953_p13  ;;  %p1002_p2 = por %p1001_p0, %p1000_p12 }
  0x37   : > { %p996_p9 = pneg %p995_p7 }
  0x39   : > { %p1003_p1 = pnand %p1002_p2, %p996_p9 }
  0x3b   : > { %1006 = shalt.err (!%p1003_p1)
}
  0x3c   : > { %s1113_s29 = smov 128   ;;  %s1114_s30 = smov 8  }
  0x3d   : > { %879 = dma.hbm_to_vmem [thread:$0]  (!%p1191_p11), %s1394_s2, 4096, %s1195_s25, [#allocation6], %s1113_s29, %s1113_s29, %s1114_s30  }
  0x3e   : > { %s1253_s6 = sadd.s32 1, %s1107_s15   ;;  %s27_s8 = sadd.s32 1, %s1103_s14 }
  0x3f   : > { %s24_s7 = ssub.s32 %s1107_s15, %s1253_s6  ;;  %p34_p6 = scmp.ne.s32.totalorder %s1103_s14, %s1099_s13 }
  0x40   : > { %p25_p13 = scmp.eq.s32.totalorder %s24_s7, 0  ;;  %p35_p10 = scmp.eq.s32.totalorder %s1107_s15, 0 }
  0x41   : > { %p1403_p5 = scmp.eq.s32.totalorder %s1161_s16, 1  ;;  %p890_p9 = scmp.lt.s32.totalorder %s1107_s15, 2 }
  0x42   : > { %s1262_s9 = scalar_select %p25_p13, %s1103_s14, %s27_s8  }
  0x43   : > { %p36_p3 = por %p35_p10, %p34_p6  ;;  %p1266_p7 = por %p1403_p5, %p34_p6 }
  0x44   : > { %s158_s10 = sand.u32 1, %s1103_s14   ;;  %s709_s25 = sshll.u32 %s1107_s15, 8 }
  0x45   : > { %s1404_s23 = scalar_select %p1266_p7, 1, 0 }
  0x46   : > { %s692_s11 = sshll.u32 %s158_s10, 4  ;;  %s1276_s24 = scalar_lea.hbm %s1392_s0, %s709_s25 }
  0x47   : > { %s162_s26 = scalar_lea.vmem [#allocation2], %s692_s11  ;;  %p1280_p11 = pnand %p890_p9, %p36_p3 }
  0x48   : > { %s169_s27 = sshll.u32 %s162_s26, 4  ;;  %s1284_s22 = scalar_lea.sflag [#allocation3], %s158_s10  ;;  %s1278_s27 = int_to_ptr.vmem [resolvable:$true] %s169_s27 }
  0x49   : > { %s1007_s4 = scalar_lea.hbm %s1276_s24, 256  ;;  %p1009_p0 = pneg %p1280_p11 }
  0x4a   : > { %p1008_p12 = scmp.ne.s32.totalorder %s1276_s24, %s1007_s4  ;;  %s1012_s8 = scalar_lea.hbm %s1392_s0, 512 }
  0x4b   : > { %p1013_p13 = scmp.lt.u32.totalorder %s1276_s24, %s1392_s0  ;;  %p1014_p6 = scmp.lt.u32.totalorder %s1012_s8, %s1007_s4 }
  0x4c   : > { %p1010_p2 = pnand %p1009_p0, %p1008_p12  ;;  %p1016_p3 = scmp.lt.u32.totalorder %s1007_s4, %s1276_s24 }
  0x4d   : > { %p1015_p10 = por %p1014_p6, %p1013_p13 }
  0x4e   : > { %p1011_p1 = pneg %p1010_p2 }
  0x4f   : > { %p1017_p5 = por %p1016_p3, %p1015_p10 }
  0x51   : > { %p1018_p9 = pnand %p1017_p5, %p1011_p1 }
  0x53   : > { %1021 = shalt.err (!%p1018_p9)
}
  0x54   : > { %s1022_s10 = scalar_lea.vmem %s1278_s27, 256  ;;  %s1115_s17 = smov [#allocation2]  }
  0x55   : > { %p1023_p12 = scmp.ne.s32.totalorder %s1278_s27, %s1022_s10  ;;  %s1027_s21 = sshll.u32 %s1115_s17, 4  ;;  %s1028_s21 = int_to_ptr.vmem [resolvable:$false] %s1027_s21 }
  0x56   : > { %s1029_s26 = scalar_lea.vmem %s1028_s21, 512  ;;  %p1030_p4 = scmp.lt.s32.totalorder %s1278_s27, %s1028_s21 }
  0x57   : > { %p1025_p2 = pnand %p1023_p12, %p1009_p0  ;;  %p1031_p13 = scmp.lt.s32.totalorder %s1029_s26, %s1022_s10 }
  0x59   : > { %p1026_p7 = pneg %p1025_p2  ;;  %p1032_p6 = por %p1031_p13, %p1030_p4 }
  0x5b   : > { %p1033_p10 = pnand %p1032_p6, %p1026_p7 }
  0x5d   : > { %1036 = shalt.err (!%p1033_p10)
}
  0x5e   : > { %883 = dma.hbm_to_vmem [thread:$0]  (!%p1280_p11), %s1276_s24, 256, %s1278_s27, %s1284_s22, %s1113_s29, %s1113_s29, %s1114_s30  }
  0x5f   : > { %181 = sbr.rel (%p1180_p8) target bundleno = 618 (0x26a), region = 32  ;;  %s1318_s4 = sand.u32 (!%p1180_p8), 1, %s1099_s13  }
  0x60   : > { %s696_s5 = sshll.u32 (!%p1180_p8), %s1318_s4, 4  ;;  %s184_s7 = scalar_lea.sflag (!%p1180_p8), [#allocation3], %s1318_s4 }
  0x61   : > { %s1324_s28 = scalar_lea.vmem (!%p1180_p8), [#allocation2], %s696_s5  ;;  %p1406_p4 = scmp.ne.s32.totalorder (!%p1180_p8), %s1399_s18, 0 }
  0x66   : > { %1082 = dma.done.wait (%p1406_p4), %s184_s7, 256  }
  0x67   : > { %1084 = vsyncadd (%p1406_p4), %s184_s7, 4294967040  ;;  %p1407_p7 = scmp.eq.s32.totalorder %s1161_s16, 0 }
  0x69   : > { %1086 = dma.done.wait (%p1407_p7), [#allocation6], 12288   ;;  %p1408_p8 = pmov %p1407_p7 }
  0x6a   : > { %v1116_v0 = vmov 0.0   ;;  %v223_v1 = vld [vmem:[#allocation5 + $0x8] sm:$0xff]  ;;  %v225_v3 = vld [vmem:[#allocation5 + $0x18] sm:$0xff]  ;;  %v222_v6 = vld [vmem:[#allocation5] sm:$0xff]  ;;  %s217_s18 = scalar_lea.vmem [#allocation8], %s696_s5  ;;  %s710_s29 = sshll.u32 %s1161_s16, 8 }
  0x6b   : > { %1088 = vsyncadd (%p1408_p8), [#allocation6], 4294955008  ;;  %350 = vmatprep.mubr.f32.mxu0 %v1116_v0  ;;  %427 = vmatprep.mubr.f32.mxu1 %v1116_v0  ;;  %v227_v2 = vld [vmem:[#allocation5 + $0x28] sm:$0xff]  ;;  %v229_v5 = vld [vmem:[#allocation5 + $0x38] sm:$0xff]  ;;  %s595_s20 = sshll.u32 %s217_s18, 4  ;;  %s1348_s27 = scalar_lea.hbm %s1395_s3, %s710_s29  ;;  %s1343_s20 = int_to_ptr.vmem [resolvable:$true] %s595_s20 }
  0x6c   : > { %v749_v4 = vpack.c.bf16 %v227_v2, %v223_v1  ;;  %v226_v7 = vld [vmem:[#allocation5 + $0x20] sm:$0xff]  ;;  %v781_v8 = vpack.c.bf16 %v229_v5, %v225_v3  ;;  %v224_v10 = vld [vmem:[#allocation5 + $0x10] sm:$0xff]  ;;  %v231_v12 = vld [vmem:[#allocation5 + $0x48] sm:$0xff]  ;;  %s582_s22 = scalar_lea.sflag [#allocation4], %s1318_s4  ;;  %s1037_s8 = scalar_lea.vmem %s1343_s20, 256 }
  0x6d   : > { %v751_v9 = vpack.c.bf16 %v226_v7, %v222_v6  ;;  %v228_v11 = vld [vmem:[#allocation5 + $0x30] sm:$0xff]  ;;  %v235_v14 = vld [vmem:[#allocation5 + $0x68] sm:$0xff]  ;;  %v233_v15 = vld [vmem:[#allocation5 + $0x58] sm:$0xff]  ;;  %p1038_p11 = scmp.ne.s32.totalorder %s1343_s20, %s1037_s8  ;;  %p1409_p0 = scmp.ne.s32.totalorder %s1404_s23, 0 }
  0x6e   : > { %750 = vmatprep.subr.bf16.mxu0 %v749_v4  ;;  %v783_v13 = vpack.c.bf16 %v228_v11, %v224_v10  ;;  %v237_v16 = vld [vmem:[#allocation5 + $0x78] sm:$0xff]  ;;  %782 = vmatprep.subr.bf16.mxu1 %v781_v8  ;;  %v753_v17 = vpack.c.bf16 %v235_v14, %v231_v12  ;;  %v230_v19 = vld [vmem:[#allocation5 + $0x40] sm:$0xff]  ;;  %v232_v21 = vld [vmem:[#allocation5 + $0x50] sm:$0xff]  ;;  %s1117_s16 = smov [#allocation8]  }
  0x6f   : > { %752 = vmatpush1.bf16.msra.mxu0 %v751_v9  ;;  %v785_v18 = vpack.c.bf16 %v237_v16, %v233_v15  ;;  %v234_v20 = vld [vmem:[#allocation5 + $0x60] sm:$0xff]  ;;  %v236_v23 = vld [vmem:[#allocation5 + $0x70] sm:$0xff]  ;;  %v239_v24 = vld [vmem:[#allocation5 + $0x88] sm:$0xff]  ;;  %p1039_p1 = pnand %p1038_p11, %p1409_p0  ;;  %s1041_s11 = sshll.u32 %s1117_s16, 4  ;;  %s1042_s11 = int_to_ptr.vmem [resolvable:$false] %s1041_s11 }
  0x70   : > { %784 = vmatpush1.bf16.msra.mxu1 %v783_v13  ;;  %v755_v22 = vpack.c.bf16 %v234_v20, %v230_v19  ;;  %v243_v25 = vld [vmem:[#allocation5 + $0xa8] sm:$0xff]  ;;  %754 = vmatprep.subr.bf16.mxu0 %v753_v17  ;;  %v787_v26 = vpack.c.bf16 %v236_v23, %v232_v21  ;;  %v241_v28 = vld [vmem:[#allocation5 + $0x98] sm:$0xff]  ;;  %v238_v30 = vld [vmem:[#allocation5 + $0x80] sm:$0xff]  ;;  %s1043_s25 = scalar_lea.vmem %s1042_s11, 512  ;;  %p1044_p5 = scmp.lt.s32.totalorder %s1343_s20, %s1042_s11 }
  0x71   : > { %786 = vmatprep.subr.bf16.mxu1 %v785_v18  ;;  %v757_v27 = vpack.c.bf16 %v243_v25, %v239_v24  ;;  %v245_v29 = vld [vmem:[#allocation5 + $0xb8] sm:$0xff]  ;;  %v242_v32 = vld [vmem:[#allocation5 + $0xa0] sm:$0xff]  ;;  %v240_v33 = vld [vmem:[#allocation5 + $0x90] sm:$0xff]  ;;  %p1040_p3 = pneg %p1039_p1  ;;  %p1045_p9 = scmp.lt.s32.totalorder %s1043_s25, %s1037_s8 }
  0x72   : > { %v789_v31 = vpack.c.bf16 %v245_v29, %v241_v28  ;;  %v244_v34 = vld [vmem:[#allocation5 + $0xb0] sm:$0xff]  ;;  %v759_v35 = vpack.c.bf16 %v242_v32, %v238_v30  ;;  %v247_v36 = vld [vmem:[#allocation5 + $0xc8] sm:$0xff]  ;;  %v249_v38 = vld [vmem:[#allocation5 + $0xd8] sm:$0xff] }
  0x73   : > { %756 = vmatpush1.bf16.msra.mxu0 %v755_v22  ;;  %v251_v37 = vld [vmem:[#allocation5 + $0xe8] sm:$0xff]  ;;  %v791_v39 = vpack.c.bf16 %v244_v34, %v240_v33  ;;  %v253_v41 = vld [vmem:[#allocation5 + $0xf8] sm:$0xff]  ;;  %v246_v42 = vld [vmem:[#allocation5 + $0xc0] sm:$0xff]  ;;  %p1046_p12 = por %p1045_p9, %p1044_p5 }
  0x74   : > { %788 = vmatpush1.bf16.msra.mxu1 %v787_v26  ;;  %758 = vmatprep.subr.bf16.mxu0 %v757_v27  ;;  %v761_v40 = vpack.c.bf16 %v251_v37, %v247_v36  ;;  %v250_v43 = vld [vmem:[#allocation5 + $0xe0] sm:$0xff]  ;;  %v793_v44 = vpack.c.bf16 %v253_v41, %v249_v38  ;;  %v248_v45 = vld [vmem:[#allocation5 + $0xd0] sm:$0xff]  ;;  %v255_v47 = vld [vmem:[#allocation5 + $0x108] sm:$0xff] }
  0x75   : > { %790 = vmatprep.subr.bf16.mxu1 %v789_v31  ;;  %v252_v46 = vld [vmem:[#allocation5 + $0xf0] sm:$0xff]  ;;  %v259_v48 = vld [vmem:[#allocation5 + $0x128] sm:$0xff]  ;;  %v257_v49 = vld [vmem:[#allocation5 + $0x118] sm:$0xff]  ;;  %v763_v51 = vpack.c.bf16 %v250_v43, %v246_v42  ;;  %p1047_p2 = pnand %p1046_p12, %p1040_p3 }
  0x76   : > { %v261_v50 = vld [vmem:[#allocation5 + $0x138] sm:$0xff]  ;;  %v795_v52 = vpack.c.bf16 %v252_v46, %v248_v45  ;;  %v765_v53 = vpack.c.bf16 %v259_v48, %v255_v47  ;;  %v254_v54 = vld [vmem:[#allocation5 + $0x100] sm:$0xff]  ;;  %v256_v56 = vld [vmem:[#allocation5 + $0x110] sm:$0xff] }
  0x77   : > { %760 = vmatpush1.bf16.msra.mxu0 %v759_v35  ;;  %v258_v55 = vld [vmem:[#allocation5 + $0x120] sm:$0xff]  ;;  %v797_v57 = vpack.c.bf16 %v261_v50, %v257_v49  ;;  %v260_v58 = vld [vmem:[#allocation5 + $0x130] sm:$0xff]  ;;  %v263_v59 = vld [vmem:[#allocation5 + $0x148] sm:$0xff] }
  0x78   : > { %792 = vmatpush1.bf16.msra.mxu1 %v791_v39  ;;  %762 = vmatprep.subr.bf16.mxu0 %v761_v40  ;;  %v267_v60 = vld [vmem:[#allocation5 + $0x168] sm:$0xff]  ;;  %v265_v61 = vld [vmem:[#allocation5 + $0x158] sm:$0xff]  ;;  %v767_v63 = vpack.c.bf16 %v258_v55, %v254_v54  ;;  %v799_v1 = vpack.c.bf16 %v260_v58, %v256_v56  ;;  %v262_v3 = vld [vmem:[#allocation5 + $0x140] sm:$0xff] }
  0x79   : > { %794 = vmatprep.subr.bf16.mxu1 %v793_v44  ;;  %v269_v62 = vld [vmem:[#allocation5 + $0x178] sm:$0xff]  ;;  %v769_v2 = vpack.c.bf16 %v267_v60, %v263_v59  ;;  %v266_v4 = vld [vmem:[#allocation5 + $0x160] sm:$0xff]  ;;  %v264_v5 = vld [vmem:[#allocation5 + $0x150] sm:$0xff] }
  0x7a   : > { %v801_v6 = vpack.c.bf16 %v269_v62, %v265_v61  ;;  %v268_v7 = vld [vmem:[#allocation5 + $0x170] sm:$0xff]  ;;  %v271_v8 = vld [vmem:[#allocation5 + $0x188] sm:$0xff]  ;;  %v273_v10 = vld [vmem:[#allocation5 + $0x198] sm:$0xff]  ;;  %v771_v12 = vpack.c.bf16 %v266_v4, %v262_v3 }
  0x7b   : > { %764 = vmatpush1.bf16.msra.mxu0 %v763_v51  ;;  %v275_v9 = vld [vmem:[#allocation5 + $0x1a8] sm:$0xff]  ;;  %v277_v11 = vld [vmem:[#allocation5 + $0x1b8] sm:$0xff]  ;;  %v803_v13 = vpack.c.bf16 %v268_v7, %v264_v5  ;;  %v270_v15 = vld [vmem:[#allocation5 + $0x180] sm:$0xff] }
  0x7c   : > { %796 = vmatpush1.bf16.msra.mxu1 %v795_v52  ;;  %766 = vmatprep.subr.bf16.mxu0 %v765_v53  ;;  %v773_v14 = vpack.c.bf16 %v275_v9, %v271_v8  ;;  %v274_v16 = vld [vmem:[#allocation5 + $0x1a0] sm:$0xff]  ;;  %v272_v17 = vld [vmem:[#allocation5 + $0x190] sm:$0xff]  ;;  %v805_v18 = vpack.c.bf16 %v277_v11, %v273_v10  ;;  %v279_v20 = vld [vmem:[#allocation5 + $0x1c8] sm:$0xff] }
  0x7d   : > { %798 = vmatprep.subr.bf16.mxu1 %v797_v57  ;;  %v276_v19 = vld [vmem:[#allocation5 + $0x1b0] sm:$0xff]  ;;  %v283_v21 = vld [vmem:[#allocation5 + $0x1e8] sm:$0xff]  ;;  %v281_v22 = vld [vmem:[#allocation5 + $0x1d8] sm:$0xff]  ;;  %v775_v24 = vpack.c.bf16 %v274_v16, %v270_v15 }
  0x7e   : > { %v285_v23 = vld [vmem:[#allocation5 + $0x1f8] sm:$0xff]  ;;  %v807_v25 = vpack.c.bf16 %v276_v19, %v272_v17  ;;  %v777_v26 = vpack.c.bf16 %v283_v21, %v279_v20  ;;  %v278_v27 = vld [vmem:[#allocation5 + $0x1c0] sm:$0xff]  ;;  %v280_v29 = vld [vmem:[#allocation5 + $0x1d0] sm:$0xff] }
  0x7f   : > { %768 = vmatpush1.bf16.msra.mxu0 %v767_v63  ;;  %v282_v28 = vld [vmem:[#allocation5 + $0x1e0] sm:$0xff]  ;;  %v809_v30 = vpack.c.bf16 %v285_v23, %v281_v22  ;;  %v284_v31 = vld [vmem:[#allocation5 + $0x1f0] sm:$0xff]  ;;  %v489_v33 = vld [vmem:[#allocation7 + $0x88] sm:$0xff] }
  0x80   : > { %800 = vmatpush1.bf16.msra.mxu1 %v799_v1  ;;  %770 = vmatprep.subr.bf16.mxu0 %v769_v2  ;;  %v488_v32 = vld [vmem:[#allocation7 + $0x80] sm:$0xff]  ;;  %v779_v34 = vpack.c.bf16 %v282_v28, %v278_v27  ;;  %v811_v35 = vpack.c.bf16 %v284_v31, %v280_v29  ;;  %v221_v38 = vld [vmem:[%s1324_s28 + $0x8] sm:$0xff]  ;;  %v490_v42 = vld [vmem:[#allocation7 + $0x90] sm:$0xff] }
  0x81   : > { %802 = vmatprep.subr.bf16.mxu1 %v801_v6  ;;  %v813_v36 = vpack.c.bf16 %v489_v33, %v488_v32  ;;  %v220_v37 = vld [vmem:[%s1324_s28] sm:$0xff]  ;;  %v473_v40 = vld [vmem:[#allocation7 + $0x8] sm:$0xff]  ;;  %v491_v43 = vld [vmem:[#allocation7 + $0x98] sm:$0xff] }
  0x82   : > { %v472_v39 = vld [vmem:[#allocation7] sm:$0xff]  ;;  %v817_v44 = vpack.c.bf16 %v491_v43, %v490_v42  ;;  %v474_v45 = vld [vmem:[#allocation7 + $0x10] sm:$0xff]  ;;  %v475_v46 = vld [vmem:[#allocation7 + $0x18] sm:$0xff] }
  0x83   : > { %772 = vmatpush1.bf16.msra.mxu0 %v771_v12  ;;  %v815_v41 = vpack.c.bf16 %v473_v40, %v472_v39  ;;  %v819_v47 = vpack.c.bf16 %v475_v46, %v474_v45  ;;  %v492_v48 = vld [vmem:[#allocation7 + $0xa0] sm:$0xff]  ;;  %v493_v49 = vld [vmem:[#allocation7 + $0xa8] sm:$0xff]  ;;  %v494_v53 = vld [vmem:[#allocation7 + $0xb0] sm:$0xff] }
  0x84   : > { %804 = vmatpush1.bf16.msra.mxu1 %v803_v13  ;;  %774 = vmatprep.subr.bf16.mxu0 %v773_v14  ;;  %v476_v50 = vld [vmem:[#allocation7 + $0x20] sm:$0xff]  ;;  %v477_v51 = vld [vmem:[#allocation7 + $0x28] sm:$0xff]  ;;  %v495_v54 = vld [vmem:[#allocation7 + $0xb8] sm:$0xff] }
  0x85   : > { %806 = vmatprep.subr.bf16.mxu1 %v805_v18  ;;  %v823_v52 = vpack.c.bf16 %v477_v51, %v476_v50  ;;  %v825_v55 = vpack.c.bf16 %v495_v54, %v494_v53  ;;  %v478_v56 = vld [vmem:[#allocation7 + $0x30] sm:$0xff]  ;;  %v479_v57 = vld [vmem:[#allocation7 + $0x38] sm:$0xff]  ;;  %v496_v59 = vld [vmem:[#allocation7 + $0xc0] sm:$0xff] }
  0x86   : > { %v827_v58 = vpack.c.bf16 %v479_v57, %v478_v56  ;;  %v497_v60 = vld [vmem:[#allocation7 + $0xc8] sm:$0xff]  ;;  %v480_v62 = vld [vmem:[#allocation7 + $0x40] sm:$0xff]  ;;  %v498_v2 = vld [vmem:[#allocation7 + $0xd0] sm:$0xff] }
  0x87   : > { %776 = vmatpush1.bf16.msra.mxu0 %v775_v24  ;;  %v829_v61 = vpack.c.bf16 %v497_v60, %v496_v59  ;;  %v481_v63 = vld [vmem:[#allocation7 + $0x48] sm:$0xff]  ;;  %v499_v3 = vld [vmem:[#allocation7 + $0xd8] sm:$0xff]  ;;  %v482_v5 = vld [vmem:[#allocation7 + $0x50] sm:$0xff] }
  0x88   : > { %808 = vmatpush1.bf16.msra.mxu1 %v807_v25  ;;  %778 = vmatprep.subr.bf16.mxu0 %v777_v26  ;;  %v831_v1 = vpack.c.bf16 %v481_v63, %v480_v62  ;;  %v833_v4 = vpack.c.bf16 %v499_v3, %v498_v2  ;;  %v483_v6 = vld [vmem:[#allocation7 + $0x58] sm:$0xff]  ;;  %v500_v8 = vld [vmem:[#allocation7 + $0xe0] sm:$0xff]  ;;  %v501_v9 = vld [vmem:[#allocation7 + $0xe8] sm:$0xff] }
  0x89   : > { %810 = vmatprep.subr.bf16.mxu1 %v809_v30  ;;  %v835_v7 = vpack.c.bf16 %v483_v6, %v482_v5  ;;  %v837_v10 = vpack.c.bf16 %v501_v9, %v500_v8  ;;  %v484_v11 = vld [vmem:[#allocation7 + $0x60] sm:$0xff]  ;;  %v485_v12 = vld [vmem:[#allocation7 + $0x68] sm:$0xff]  ;;  %v502_v14 = vld [vmem:[#allocation7 + $0xf0] sm:$0xff] }
  0x8a   : > { %v839_v13 = vpack.c.bf16 %v485_v12, %v484_v11  ;;  %v503_v15 = vld [vmem:[#allocation7 + $0xf8] sm:$0xff]  ;;  %v486_v17 = vld [vmem:[#allocation7 + $0x70] sm:$0xff] }
  0x8b   : > { %780 = vmatpush1.bf16.msra.mxu0 %v779_v34  ;;  %v841_v16 = vpack.c.bf16 %v503_v15, %v502_v14  ;;  %v487_v18 = vld [vmem:[#allocation7 + $0x78] sm:$0xff] }
  0x8c   : > { %812 = vmatpush1.bf16.msra.mxu1 %v811_v35  ;;  %814 = vmatprep.subr.bf16.mxu0 %v813_v36  ;;  %v843_v19 = vpack.c.bf16 %v487_v18, %v486_v17 }
  0x8d   : > { %845 = vmatprep.subr.bf16.mxu1 %v813_v36 }
  0x8e   : > { %351 = vmatmul.mubr.f32.vlgmr.msra.gmra.mrb[0].mxu0 %v220_v37 }
  0x8f   : > { %428 = vmatmul.mubr.f32.vlgmr.msra.gmra.mrb[0].mxu1 %v220_v37  ;;  %356 = vmatprep.mubr.f32.mxu0 %v1116_v0 }
  0x90   : > { %433 = vmatprep.mubr.f32.mxu1 %v1116_v0  ;;  %816 = vmatpush3.bf16.msra.mxu0 %v815_v41  ;;  %v821_v0 = vpack.c.bf16 %v493_v49, %v492_v48 }
  0x91   : > { %853 = vmatpush3.bf16.msra.mxu1 %v815_v41  ;;  %818 = vmatprep.subr.bf16.mxu0 %v817_v44 }
  0x92   : > { %357 = vmatmul.mubr.f32.gmra.mrb[2].mxu0 %v221_v38  ;;  %846 = vmatprep.subr.bf16.mxu1 %v817_v44 }
  0x93   : > { %434 = vmatmul.mubr.f32.gmra.mrb[2].mxu1 %v221_v38 }
  0x94   : > { %820 = vmatpush3.bf16.msra.mxu0 %v819_v47 }
  0x95   : > { %854 = vmatpush3.bf16.msra.mxu1 %v819_v47  ;;  %822 = vmatprep.subr.bf16.mxu0 %v821_v0 }
  0x96   : > { %847 = vmatprep.subr.bf16.mxu1 %v821_v0 }
  0x98   : > { %824 = vmatpush3.bf16.msra.mxu0 %v823_v52 }
  0x99   : > { %855 = vmatpush3.bf16.msra.mxu1 %v823_v52  ;;  %826 = vmatprep.subr.bf16.mxu0 %v825_v55 }
  0x9a   : > { %848 = vmatprep.subr.bf16.mxu1 %v825_v55 }
  0x9c   : > { %828 = vmatpush3.bf16.msra.mxu0 %v827_v58 }
  0x9d   : > { %856 = vmatpush3.bf16.msra.mxu1 %v827_v58  ;;  %830 = vmatprep.subr.bf16.mxu0 %v829_v61 }
  0x9e   : > { %849 = vmatprep.subr.bf16.mxu1 %v829_v61 }
  0xa0   : > { %832 = vmatpush3.bf16.msra.mxu0 %v831_v1 }
  0xa1   : > { %857 = vmatpush3.bf16.msra.mxu1 %v831_v1  ;;  %834 = vmatprep.subr.bf16.mxu0 %v833_v4 }
  0xa2   : > { %850 = vmatprep.subr.bf16.mxu1 %v833_v4 }
  0xa4   : > { %836 = vmatpush3.bf16.msra.mxu0 %v835_v7 }
  0xa5   : > { %858 = vmatpush3.bf16.msra.mxu1 %v835_v7  ;;  %838 = vmatprep.subr.bf16.mxu0 %v837_v10 }
  0xa6   : > { %851 = vmatprep.subr.bf16.mxu1 %v837_v10 }
  0xa8   : > { %840 = vmatpush3.bf16.msra.mxu0 %v839_v13 }
  0xa9   : > { %859 = vmatpush3.bf16.msra.mxu1 %v839_v13  ;;  %842 = vmatprep.subr.bf16.mxu0 %v841_v16 }
  0xaa   : > { %852 = vmatprep.subr.bf16.mxu1 %v841_v16 }
  0xac   : > { %844 = vmatpush3.bf16.msra.mxu0 %v843_v19 }
  0xad   : > { %860 = vmatpush3.bf16.msra.mxu1 %v843_v19 }
 0x161   : > { %v352_v20 = vpop.f32.mrb[0].mxu0 }
 0x162   : > { %v700_v21 = vmul.f32 -1.442695, %v352_v20  ;;  %v429_v22 = vpop.f32.mrb[0].mxu1  ;;  %v354_v23 = vpop.f32.mrb[1].mxu0 }
 0x163   : > { %v440_v24 = vmul.f32 %v429_v22, %v352_v20  ;;  %v701_v25 = vmul.f32 -1.442695, %v354_v23  ;;  %v431_v26 = vpop.f32.mrb[1].mxu1 }
 0x164   : > { %935 = vpow2.f32 %v700_v21  ;;  %v441_v27 = vmul.f32 %v431_v26, %v354_v23 }
 0x165   : > { %937 = vpow2.f32 %v701_v25  ;;  %v358_v28 = vpop.f32.mrb[2].mxu0 }
 0x166   : > { %v702_v29 = vmul.f32 -1.442695, %v358_v28  ;;  %v435_v30 = vpop.f32.mrb[2].mxu1  ;;  %v360_v31 = vpop.f32.mrb[3].mxu0 }
 0x167   : > { %v442_v32 = vmul.f32 %v435_v30, %v358_v28  ;;  %v703_v33 = vmul.f32 -1.442695, %v360_v31  ;;  %v437_v34 = vpop.f32.mrb[3].mxu1 }
 0x168   : > { %939 = vpow2.f32 %v702_v29  ;;  %v443_v35 = vmul.f32 %v437_v34, %v360_v31 }
 0x169   : > { %941 = vpow2.f32 %v703_v33 }
 0x16e   : > { %v936_v36 = vpop.eup %935 }
 0x16f   : > { %v938_v37 = vpop.eup %937  ;;  %v456_v38 = vadd.f32 1.0, %v936_v36 }
 0x170   : > { %v457_v39 = vadd.f32 1.0, %v938_v37 }
 0x171   : > { %943 = vrcp.f32 %v456_v38 }
 0x172   : > { %v940_v40 = vpop.eup %939  ;;  %945 = vrcp.f32 %v457_v39 }
 0x173   : > { %v942_v41 = vpop.eup %941  ;;  %v458_v42 = vadd.f32 1.0, %v940_v40 }
 0x174   : > { %v459_v43 = vadd.f32 1.0, %v942_v41 }
 0x175   : > { %947 = vrcp.f32 %v458_v42 }
 0x176   : > { %949 = vrcp.f32 %v459_v43 }
 0x17b   : > { %v944_v44 = vpop.eup %943 }
 0x17c   : > { %v946_v45 = vpop.eup %945  ;;  %v468_v46 = vmul.f32 %v944_v44, %v440_v24 }
 0x17d   : > { %v469_v47 = vmul.f32 %v946_v45, %v441_v27 }
 0x17f   : > { %v948_v48 = vpop.eup %947  ;;  %568 = vmatprep.mubr.f32.mxu0 %v469_v47 }
 0x180   : > { %v950_v49 = vpop.eup %949  ;;  %v470_v0 = vmul.f32 %v948_v48, %v442_v32  ;;  %569 = vmatmul.mubr.f32.vlgmr.msra.gmra.mrb[4].mxu0 %v468_v46 }
 0x181   : > { %v471_v50 = vmul.f32 %v950_v49, %v443_v35 }
 0x183   : > { %573 = vmatprep.mubr.f32.mxu1 %v471_v50 }
 0x184   : > { %574 = vmatmul.mubr.f32.vlgmr.msra.gmra.mrb[4].mxu1 %v470_v0 }
 0x253   : > { %v743_v51 = vpop.f32.mrb[4].mxu0 }
 0x254   : > { %v744_v52 = vpop.f32.mrb[5].mxu0 }
 0x255   : > { %v745_v53 = vadd.f32 %v744_v52, %v743_v51 }
 0x257   : > { %579 = vst [vmem:[%s217_s18] sm:$0xff] %v745_v53  ;;  %v746_v54 = vpop.f32.mrb[4].mxu1 }
 0x258   : > { %v747_v55 = vpop.f32.mrb[5].mxu1 }
 0x259   : > { %v748_v56 = vadd.f32 %v747_v55, %v746_v54 }
 0x25b   : > { %580 = vst [vmem:[%s217_s18 + $0x8] sm:$0xff] %v748_v56 }
 0x25c   : > { %1050 = shalt.err (!%p1047_p2)
}
 0x25d   : > { %s1051_s10 = scalar_lea.hbm %s1348_s27, 256  ;;  %s1055_s26 = scalar_lea.hbm %s1395_s3, 512 }
 0x25e   : > { %p1052_p13 = scmp.ne.s32.totalorder %s1348_s27, %s1051_s10  ;;  %p1056_p4 = scmp.lt.u32.totalorder %s1348_s27, %s1395_s3 }
 0x25f   : > { %p1057_p7 = scmp.lt.u32.totalorder %s1055_s26, %s1051_s10  ;;  %p1059_p11 = scmp.lt.u32.totalorder %s1051_s10, %s1348_s27 }
 0x260   : > { %p1053_p6 = pnand %p1052_p13, %p1409_p0 }
 0x261   : > { %p1058_p8 = por %p1057_p7, %p1056_p4 }
 0x262   : > { %p1054_p10 = pneg %p1053_p6 }
 0x263   : > { %p1060_p1 = por %p1059_p11, %p1058_p8 }
 0x265   : > { %p1061_p3 = pnand %p1060_p1, %p1054_p10 }
 0x267   : > { %1064 = shalt.err (!%p1061_p3)
}
 0x268   : > { %s1118_s28 = smov 128   ;;  %s1119_s18 = smov 8  }
 0x269   : > { %871 = dma.vmem_to_hbm [thread:$0]  (%p1409_p0), %s1343_s20, 256, %s1348_s27, %s582_s22, %s1118_s28, %s1118_s28, %s1119_s18  }
 0x26a PF: > { %s610_s29 = sand.u32 1, %s1095_s12   ;;  %p1410_p5 = scmp.ne.s32.totalorder %s1400_s19, 0 }
 0x26b   : > { %p1411_p9 = scmp.ge.s32.totalorder %s1107_s15, 2  ;;  %s611_s30 = scalar_lea.sflag [#allocation4], %s610_s29 }
 0x26d   : > { %p885_p12 = pnand %p1411_p9, %p1410_p5 }
 0x26f   : > { %1090 = dma.done.wait (!%p885_p12), %s611_s30, 256  }
 0x270   : > { %1092 = vsyncadd (!%p885_p12), %s611_s30, 4294967040  ;;  %p17_p2 = scmp.ge.s32.totalorder %s1253_s6, 4   ;;  %s1412_s12 = smov %s1099_s13 }
 0x271   : > { %s1413_s13 = smov %s1103_s14  ;;  %s1414_s14 = smov %s1262_s9 }
 0x272   : > { %s1415_s15 = smov %s1253_s6  ;;  %19 = sbr.rel (!%p17_p2) target bundleno = 6 (0x6), region = 85 }
 0x279   :  { %616 = vsyncpa [#allocation3], 1 }
 0x27a   :  { %618 = vsyncpa [#allocation3 + $0x1], 1 }
 0x27b   :  { %619 = vsyncpa [#allocation6], 1 }
 0x27c   :  { %620 = vsyncpa [#allocation4], 1 }
 0x27d   :  { %622 = vsyncpa [#allocation4 + $0x1], 1 }

</bundles_post_ra>
